<compile_context>
chip_gen: v7x
topology: tpu7x:2x2x1
jax: 0.10.0
libtpu: 0.0.40
codegen_flags: <defaults>
</compile_context>

<pallas_src>
import functools

import jax
import jax.numpy as jnp
from jax.experimental import pallas as pl
from jax.experimental.pallas import tpu as pltpu


def _round_up(x, m):
    return -(-x // m) * m


# ----------------------------------------------------------------------------
# Pallas kernel 1: banded ROIAlign contraction.
#   Grid step b handles rois_per_block ROIs (all from one image).  For ROI j:
#     pooled_j[PP_pad, C] = S_j[PP_pad, WIN_H*W] @ feat_band_j[WIN_H*W, C]
#   with feat_band_j a pl.ds row-window of the per-image feature map, whose
#   start row comes from a scalar-prefetched per-ROI offset.
# ----------------------------------------------------------------------------
def _roi_pool_kernel(block_img_ref, row_start_ref, s_ref, feat_ref, out_ref,
                     *, rois_per_block, pp_pad, band_flat, width):
    del block_img_ref  # consumed only by the feature-map index_map
    b = pl.program_id(0)
    for j in range(rois_per_block):            # short static loop, unrolled
        start = row_start_ref[b * rois_per_block + j]
        if width % 8 == 0:
            start = pl.multiple_of(start, 8)   # band origin is a whole-row offset
        fband = feat_ref[pl.ds(start, band_flat), :]          # [WIN_H*W, C]
        s_j = s_ref[j * pp_pad:(j + 1) * pp_pad, :]           # [PP_pad, WIN_H*W]
        out_ref[j * pp_pad:(j + 1) * pp_pad, :] = jnp.dot(
            s_j, fband, preferred_element_type=jnp.float32
        ).astype(out_ref.dtype)


def roi_pool(features_hwc, samp_band, block_img, row_start,
             rois_per_block, pp_pad, width):
    """features_hwc: [N, H*W, C] bf16, samp_band: [R*PP_pad, WIN_H*W] bf16,
    block_img: [R//rois_per_block] int32, row_start: [R] int32
    -> pooled [R*PP_pad, C] bf16."""
    N, HW, C = features_hwc.shape
    rows, band_flat = samp_band.shape
    blk_rows = rois_per_block * pp_pad          # multiple of 16 by construction
    num_blocks = rows // blk_rows
    kernel = functools.partial(
        _roi_pool_kernel, rois_per_block=rois_per_block, pp_pad=pp_pad,
        band_flat=band_flat, width=width)
    return pl.pallas_call(
        kernel,
        out_shape=jax.ShapeDtypeStruct((rows, C), jnp.bfloat16),
        grid_spec=pltpu.PrefetchScalarGridSpec(
            num_scalar_prefetch=2,
            grid=(num_blocks,),
            in_specs=[
                pl.BlockSpec((blk_rows, band_flat), lambda b, bi, rs: (b, 0)),
                pl.BlockSpec((None, HW, C), lambda b, bi, rs: (bi[b], 0, 0)),
            ],
            out_specs=pl.BlockSpec((blk_rows, C), lambda b, bi, rs: (b, 0)),
        ),
        compiler_params=pltpu.CompilerParams(
            dimension_semantics=("parallel",),
            vmem_limit_bytes=48 * 1024 * 1024),
    )(block_img, row_start, samp_band, features_hwc)


# ----------------------------------------------------------------------------
# Pallas kernel 2: fused MLP feature extractor (fc6/fc7) + fused cls/box heads.
# Grid: (ROI row tiles [parallel], fc6 contraction tiles [arbitrary]).
# fc6 is accumulated in a VMEM f32 scratch; fc7 + heads run on the last k step.
# ----------------------------------------------------------------------------
def _mlp_head_kernel(x_ref, w6_ref, b6_ref, w7_ref, b7_ref, wcb_ref, bcb_ref,
                     feat_out_ref, cb_out_ref, acc_ref):
    k = pl.program_id(1)

    @pl.when(k == 0)
    def _():
        acc_ref[...] = jnp.zeros_like(acc_ref)

    acc_ref[...] += jnp.dot(x_ref[...], w6_ref[...],
                            preferred_element_type=jnp.float32)

    @pl.when(k == pl.num_programs(1) - 1)
    def _():
        # bias add / ReLU in f32 on the VPU; matmul inputs cast to bf16 for MXU.
        h6 = jnp.maximum(acc_ref[...] + b6_ref[...], 0.0)
        h7 = jnp.maximum(
            jnp.dot(h6.astype(w7_ref.dtype), w7_ref[...],
                    preferred_element_type=jnp.float32) + b7_ref[...], 0.0)
        feat_out_ref[...] = h7.astype(feat_out_ref.dtype)   # bf16 writeback
        cb_out_ref[...] = (
            jnp.dot(h7.astype(wcb_ref.dtype), wcb_ref[...],
                    preferred_element_type=jnp.float32) + bcb_ref[...]
        ).astype(cb_out_ref.dtype)


def mlp_head(x_flat, w6, b6, w7, b7, wcb, bcb, row_tile, k_tile):
    Rp, Dp = x_flat.shape
    H = w6.shape[1]
    Ncb = wcb.shape[1]
    grid = (Rp // row_tile, Dp // k_tile)
    return pl.pallas_call(
        _mlp_head_kernel,
        out_shape=(
            jax.ShapeDtypeStruct((Rp, H), jnp.bfloat16),   # extracted features
            jax.ShapeDtypeStruct((Rp, Ncb), jnp.float32),  # fused cls+box logits
        ),
        grid=grid,
        in_specs=[
            pl.BlockSpec((row_tile, k_tile), lambda i, k: (i, k)),
            pl.BlockSpec((k_tile, H), lambda i, k: (k, 0)),
            # Constant-index resident blocks below; pl.Buffered(1) would halve
            # their VMEM footprint on production shapes.
            pl.BlockSpec((1, H), lambda i, k: (0, 0)),
            pl.BlockSpec((H, H), lambda i, k: (0, 0)),
            pl.BlockSpec((1, H), lambda i, k: (0, 0)),
            pl.BlockSpec((H, Ncb), lambda i, k: (0, 0)),
            pl.BlockSpec((1, Ncb), lambda i, k: (0, 0)),
        ],
        out_specs=(
            pl.BlockSpec((row_tile, H), lambda i, k: (i, 0)),
            pl.BlockSpec((row_tile, Ncb), lambda i, k: (i, 0)),
        ),
        scratch_shapes=[pltpu.VMEM((row_tile, H), jnp.float32)],
        compiler_params=pltpu.CompilerParams(
            dimension_semantics=("parallel", "arbitrary"),
            vmem_limit_bytes=48 * 1024 * 1024),
    )(x_flat, w6, b6, w7, b7, wcb, bcb)


# ----------------------------------------------------------------------------
# Host-side glue: banded ROIAlign sampling matrix (index/weight setup only).
# Faithful to maskrcnn_benchmark ROIAlign (aligned=False): per-sample clamping
# and the (y<-1 | y>H | x<-1 | x>W) validity test, expressed separably so the
# matrix is built with broadcasting (no scatter) over a WIN_H-row band.
# ----------------------------------------------------------------------------
def roi_align_band_matrices(boxes, H, W, P, spatial_scale, sampling_ratio, win_h):
    R = boxes.shape[0]
    sr = sampling_ratio
    x1 = boxes[:, 0] * spatial_scale
    y1 = boxes[:, 1] * spatial_scale
    x2 = boxes[:, 2] * spatial_scale
    y2 = boxes[:, 3] * spatial_scale
    roi_w = jnp.maximum(x2 - x1, 1.0)
    roi_h = jnp.maximum(y2 - y1, 1.0)
    bin_w = roi_w / P
    bin_h = roi_h / P

    pbin = jnp.arange(P, dtype=jnp.float32)
    samp = jnp.arange(sr, dtype=jnp.float32)
    # sample coordinates: [R, P(bin), sr(sample)]
    ys = (y1[:, None, None] + pbin[None, :, None] * bin_h[:, None, None]
          + (samp[None, None, :] + 0.5) * bin_h[:, None, None] / sr)
    xs = (x1[:, None, None] + pbin[None, :, None] * bin_w[:, None, None]
          + (samp[None, None, :] + 0.5) * bin_w[:, None, None] / sr)

    def bilinear_1d(coord, size):
        valid = ((coord >= -1.0) & (coord <= size)).astype(jnp.float32)
        c = jnp.maximum(coord, 0.0)
        low = jnp.minimum(jnp.floor(c), size - 1.0)
        high = jnp.minimum(low + 1.0, size - 1.0)
        c = jnp.where(low >= size - 1.0, low, c)
        l = c - low
        h = 1.0 - l
        return low.astype(jnp.int32), high.astype(jnp.int32), h, l, valid

    y_lo, y_hi, hy, ly, vy = bilinear_1d(ys, float(H))
    x_lo, x_hi, hx, lx, vx = bilinear_1d(xs, float(W))

    # Band origin per ROI: first touched row (samples are monotone in (bin, iy)),
    # clamped so the static window stays inside the feature map.
    oy = jnp.clip(y_lo[:, 0, 0], 0, H - win_h)                 # [R]
    row_start = (oy * W).astype(jnp.int32)

    # Separable 1-D weight profiles (validity folded per axis).
    wy_idx = jnp.arange(win_h)[None, None, None, :]
    y_lo_l = (y_lo - oy[:, None, None])[..., None]
    y_hi_l = (y_hi - oy[:, None, None])[..., None]
    ay = ((wy_idx == y_lo_l).astype(jnp.float32) * hy[..., None]
          + (wy_idx == y_hi_l).astype(jnp.float32) * ly[..., None])
    ay = (ay * vy[..., None]).sum(axis=2)                       # [R, P, win_h]

    wx_idx = jnp.arange(W)[None, None, None, :]
    ax = ((wx_idx == x_lo[..., None]).astype(jnp.float32) * hx[..., None]
          + (wx_idx == x_hi[..., None]).astype(jnp.float32) * lx[..., None])
    ax = (ax * vx[..., None]).sum(axis=2)                       # [R, P, W]

    inv_count = 1.0 / float(sr * sr)
    # Outer product -> banded sampling matrix [R, P*P, win_h*W] (ph-major bins).
    s = inv_count * (ay[:, :, None, :, None] * ax[:, None, :, None, :])
    s = s.reshape(R, P * P, win_h * W)
    return s, row_start


# ----------------------------------------------------------------------------
# ROIBoxHead forward (inference path, use_relation_nms=True -> no post-processing)
# Requires ROIs sorted by image (standard per-image proposal lists), a per-image
# ROI count divisible by rois_per_block (blocks never straddle images), and a
# band_rows window covering the tallest ROI's bilinear footprint (bounded by
# FPN-style level assignment in real configs).
# ----------------------------------------------------------------------------
def roi_box_head_forward(features, boxes, batch_idx, params,
                         pooled_size, spatial_scale, sampling_ratio,
                         rois_per_block, num_classes, band_rows):
    N, C, H, W = features.shape
    R = boxes.shape[0]
    P = pooled_size
    PP = P * P
    PP_pad = _round_up(PP, 16)      # 16-aligned per-ROI rows -> aligned bf16 tiles
    assert R % rois_per_block == 0, "R must be a multiple of rois_per_block"
    win_h = min(band_rows, H)

    # [N, H*W, C] bf16: pixel index on sublanes, C lane-dense.
    feat_hwc = features.reshape(N, C, H * W).transpose(0, 2, 1).astype(jnp.bfloat16)

    # Banded sampling matrix built directly in bf16 (no dense H*W scatter).
    s_band, row_start = roi_align_band_matrices(
        boxes, H, W, P, spatial_scale, sampling_ratio, win_h)   # [R, PP, win_h*W]
    s_band = jnp.pad(s_band, ((0, 0), (0, PP_pad - PP), (0, 0)))
    s_band = s_band.astype(jnp.bfloat16).reshape(R * PP_pad, win_h * W)

    # block -> image index for the scalar-prefetched feature index_map.
    block_img = batch_idx[::rois_per_block].astype(jnp.int32)

    pooled = roi_pool(feat_hwc, s_band, block_img, row_start,
                      rois_per_block, PP_pad, W)                # [R*PP_pad, C] bf16
    x_flat = pooled.reshape(R, PP_pad * C)                      # PP-major flatten
    # TODO(synk): fuse roi_pool into the fc6 k-loop to drop this HBM round trip.

    # Re-layout fc6 weights once: torch .view flatten is C-major (row = c*PP+p);
    # our pooled flatten is PP-major (row = p*C+c); padded bins get zero rows.
    Hd = params["w6"].shape[1]
    w6 = params["w6"].reshape(C, PP, Hd).transpose(1, 0, 2)      # [PP, C, Hd]
    w6 = jnp.pad(w6, ((0, PP_pad - PP), (0, 0), (0, 0)))
    w6 = w6.reshape(PP_pad * C, Hd).astype(jnp.bfloat16)
    w7 = params["w7"].astype(jnp.bfloat16)
    b6 = params["b6"].astype(jnp.float32)
    b7 = params["b7"].astype(jnp.float32)

    # Fuse cls/box heads into one lane-padded matmul; slice results afterwards.
    NC = num_classes
    wcb = jnp.concatenate([params["wc"], params["wb"]], axis=1)
    bcb = jnp.concatenate([params["bc"], params["bb"]], axis=1)
    ncb = wcb.shape[1]
    ncb_pad = _round_up(ncb, 128)
    wcb = jnp.pad(wcb, ((0, 0), (0, ncb_pad - ncb))).astype(jnp.bfloat16)
    bcb = jnp.pad(bcb, ((0, 0), (0, ncb_pad - ncb))).astype(jnp.float32)

    # Tile selection: pad rows / contraction up to the tile instead of ever
    # collapsing a tile to the full dim (keeps row pipelining + megacore for
    # arbitrary R, e.g. R=1000).
    Din = PP_pad * C
    row_tile = 256 if R >= 256 else _round_up(R, 16)
    k_tile = 512 if Din >= 512 else Din
    R_pad = _round_up(R, row_tile)
    Din_pad = _round_up(Din, k_tile)
    if R_pad != R:
        x_flat = jnp.pad(x_flat, ((0, R_pad - R), (0, 0)))
    if Din_pad != Din:
        x_flat = jnp.pad(x_flat, ((0, 0), (0, Din_pad - Din)))
        w6 = jnp.pad(w6, ((0, Din_pad - Din), (0, 0)))

    x, cb = mlp_head(x_flat, w6, b6, w7, b7, wcb, bcb, row_tile, k_tile)
    x = x[:R]                                   # bf16 extracted features
    class_logits = cb[:R, :NC]
    box_regression = cb[:R, NC:NC + 4 * NC]
    proposals = boxes                           # returned unchanged (no NMS path)
    return x, proposals, {}, class_logits, box_regression


def init_params(key, in_dim, hidden, num_classes):
    k6, k7, kc, kb = jax.random.split(key, 4)
    f = jnp.float32
    return {
        "w6": 0.01 * jax.random.normal(k6, (in_dim, hidden), f),
        "b6": jnp.zeros((1, hidden), f),
        "w7": 0.01 * jax.random.normal(k7, (hidden, hidden), f),
        "b7": jnp.zeros((1, hidden), f),
        "wc": 0.01 * jax.random.normal(kc, (hidden, num_classes), f),
        "bc": jnp.zeros((1, num_classes), f),
        "wb": 0.001 * jax.random.normal(kb, (hidden, 4 * num_classes), f),
        "bb": jnp.zeros((1, 4 * num_classes), f),
    }


if __name__ == "__main__":
    key = jax.random.PRNGKey(0)
    k_feat, k_box, k_param = jax.random.split(key, 3)

    # small config
    N, C, H, W = 2, 4, 16, 16          # feature map NCHW
    IMG = 64                            # image size -> spatial_scale = 16/64
    P = 4                               # pooler resolution
    SR = 2                              # sampling ratio
    HIDDEN = 32                         # MLP head dim
    NUM_CLASSES = 8
    ROIS_PER_IMG = 4
    R = N * ROIS_PER_IMG
    BAND_ROWS = 8                       # covers max ROI footprint: 20px*0.25 + 2

    features = jax.random.normal(k_feat, (N, C, H, W), jnp.float32)

    # deterministic xyxy proposal boxes in image coordinates (sorted by image)
    u = jax.random.uniform(k_box, (R, 4), jnp.float32)
    x1 = u[:, 0] * (IMG - 20.0)
    y1 = u[:, 1] * (IMG - 20.0)
    x2 = x1 + 8.0 + u[:, 2] * 12.0
    y2 = y1 + 8.0 + u[:, 3] * 12.0
    boxes = jnp.stack([x1, y1, x2, y2], axis=1)
    batch_idx = jnp.repeat(jnp.arange(N, dtype=jnp.int32), ROIS_PER_IMG)

    params = init_params(k_param, C * P * P, HIDDEN, NUM_CLASSES)

    fwd = jax.jit(functools.partial(
        roi_box_head_forward,
        pooled_size=P, spatial_scale=float(H) / IMG, sampling_ratio=SR,
        rois_per_block=ROIS_PER_IMG, num_classes=NUM_CLASSES,
        band_rows=BAND_ROWS))

    x, proposals, losses, class_logits, box_regression = fwd(
        features, boxes, batch_idx, params)
    jax.block_until_ready((x, class_logits, box_regression))

    assert x.shape == (R, HIDDEN)
    assert class_logits.shape == (R, NUM_CLASSES)
    assert box_regression.shape == (R, 4 * NUM_CLASSES)
    assert losses == {}
    assert bool(jnp.isfinite(class_logits).all())
    assert bool(jnp.isfinite(box_regression).all())
    print("KERNEL_OK")
</pallas_src>

<mosaic_0001>
module attributes {stable_mosaic.version = 11 : i64} {
  func.func @_roi_pool_kernel(%arg0: i32, %arg1: memref<2xi32, #tpu.memory_space<smem>>, %arg2: memref<8xi32, #tpu.memory_space<smem>>, %arg3: memref<64x128xbf16, #tpu.memory_space<vmem>>, %arg4: memref<1x256x4xbf16, #tpu.memory_space<vmem>>, %arg5: memref<64x4xbf16, #tpu.memory_space<vmem>>) attributes {dimension_semantics = [#tpu.dimension_semantics<parallel>], iteration_bounds = array<i64: 2>, scalar_prefetch = 2 : i64, scratch_operands = 0 : i64, tpu.core_type = #tpu.core_type<tc>, window_params = [{transform_indices = @transform_0, window_bounds = array<i64: 64, 128>}, {transform_indices = @transform_1, window_bounds = array<i64: 1, 256, 4>}, {transform_indices = @transform_2, window_bounds = array<i64: 64, 4>}]} {
    %c4_i32 = arith.constant 4 : i32
    %0 = arith.muli %arg0, %c4_i32 : i32
    %c0_i32 = arith.constant 0 : i32
    %1 = arith.addi %0, %c0_i32 : i32
    %2 = arith.index_cast %1 : i32 to index
    %3 = memref.load %arg2[%2] : memref<8xi32, #tpu.memory_space<smem>>
    %4 = tpu.assume_multiple %3, 8 : i32
    %c0 = arith.constant 0 : index
    %5 = arith.index_cast %4 : i32 to index
    %c0_0 = arith.constant 0 : index
    %6 = vector.load %arg4[%c0, %5, %c0_0] : memref<1x256x4xbf16, #tpu.memory_space<vmem>>, vector<1x128x4xbf16>
    %7 = vector.shape_cast %6 : vector<1x128x4xbf16> to vector<128x4xbf16>
    %c0_1 = arith.constant 0 : index
    %c0_2 = arith.constant 0 : index
    %8 = vector.load %arg3[%c0_1, %c0_2] : memref<64x128xbf16, #tpu.memory_space<vmem>>, vector<16x128xbf16>
    %cst = arith.constant dense<0.000000e+00> : vector<16x4xf32>
    %9 = tpu.matmul %8, %7, %cst {dimension_numbers = #tpu.dot_dimension_numbers<[1], [0], [0], [1], [0, 0, 1, 1], [], []>} : vector<16x128xbf16>, vector<128x4xbf16>, vector<16x4xf32> -> vector<16x4xf32>
    %10 = arith.truncf %9 : vector<16x4xf32> to vector<16x4xbf16>
    %c0_3 = arith.constant 0 : index
    %c0_4 = arith.constant 0 : index
    %11 = vector.load %arg5[%c0_3, %c0_4] : memref<64x4xbf16, #tpu.memory_space<vmem>>, vector<16x4xbf16>
    tpu.vector_store %arg5[%c0_3, %c0_4], %10 {strides = array<i32>} : memref<64x4xbf16, #tpu.memory_space<vmem>>, vector<16x4xbf16>,
    %c4_i32_5 = arith.constant 4 : i32
    %12 = arith.muli %arg0, %c4_i32_5 : i32
    %c1_i32 = arith.constant 1 : i32
    %13 = arith.addi %12, %c1_i32 : i32
    %14 = arith.index_cast %13 : i32 to index
    %15 = memref.load %arg2[%14] : memref<8xi32, #tpu.memory_space<smem>>
    %16 = tpu.assume_multiple %15, 8 : i32
    %c0_6 = arith.constant 0 : index
    %17 = arith.index_cast %16 : i32 to index
    %c0_7 = arith.constant 0 : index
    %18 = vector.load %arg4[%c0_6, %17, %c0_7] : memref<1x256x4xbf16, #tpu.memory_space<vmem>>, vector<1x128x4xbf16>
    %19 = vector.shape_cast %18 : vector<1x128x4xbf16> to vector<128x4xbf16>
    %c16 = arith.constant 16 : index
    %c0_8 = arith.constant 0 : index
    %20 = vector.load %arg3[%c16, %c0_8] : memref<64x128xbf16, #tpu.memory_space<vmem>>, vector<16x128xbf16>
    %cst_9 = arith.constant dense<0.000000e+00> : vector<16x4xf32>
    %21 = tpu.matmul %20, %19, %cst_9 {dimension_numbers = #tpu.dot_dimension_numbers<[1], [0], [0], [1], [0, 0, 1, 1], [], []>} : vector<16x128xbf16>, vector<128x4xbf16>, vector<16x4xf32> -> vector<16x4xf32>
    %22 = arith.truncf %21 : vector<16x4xf32> to vector<16x4xbf16>
    %c16_10 = arith.constant 16 : index
    %c0_11 = arith.constant 0 : index
    %23 = vector.load %arg5[%c16_10, %c0_11] : memref<64x4xbf16, #tpu.memory_space<vmem>>, vector<16x4xbf16>
    tpu.vector_store %arg5[%c16_10, %c0_11], %22 {strides = array<i32>} : memref<64x4xbf16, #tpu.memory_space<vmem>>, vector<16x4xbf16>,
    %c4_i32_12 = arith.constant 4 : i32
    %24 = arith.muli %arg0, %c4_i32_12 : i32
    %c2_i32 = arith.constant 2 : i32
    %25 = arith.addi %24, %c2_i32 : i32
    %26 = arith.index_cast %25 : i32 to index
    %27 = memref.load %arg2[%26] : memref<8xi32, #tpu.memory_space<smem>>
    %28 = tpu.assume_multiple %27, 8 : i32
    %c0_13 = arith.constant 0 : index
    %29 = arith.index_cast %28 : i32 to index
    %c0_14 = arith.constant 0 : index
    %30 = vector.load %arg4[%c0_13, %29, %c0_14] : memref<1x256x4xbf16, #tpu.memory_space<vmem>>, vector<1x128x4xbf16>
    %31 = vector.shape_cast %30 : vector<1x128x4xbf16> to vector<128x4xbf16>
    %c32 = arith.constant 32 : index
    %c0_15 = arith.constant 0 : index
    %32 = vector.load %arg3[%c32, %c0_15] : memref<64x128xbf16, #tpu.memory_space<vmem>>, vector<16x128xbf16>
    %cst_16 = arith.constant dense<0.000000e+00> : vector<16x4xf32>
    %33 = tpu.matmul %32, %31, %cst_16 {dimension_numbers = #tpu.dot_dimension_numbers<[1], [0], [0], [1], [0, 0, 1, 1], [], []>} : vector<16x128xbf16>, vector<128x4xbf16>, vector<16x4xf32> -> vector<16x4xf32>
    %34 = arith.truncf %33 : vector<16x4xf32> to vector<16x4xbf16>
    %c32_17 = arith.constant 32 : index
    %c0_18 = arith.constant 0 : index
    %35 = vector.load %arg5[%c32_17, %c0_18] : memref<64x4xbf16, #tpu.memory_space<vmem>>, vector<16x4xbf16>
    tpu.vector_store %arg5[%c32_17, %c0_18], %34 {strides = array<i32>} : memref<64x4xbf16, #tpu.memory_space<vmem>>, vector<16x4xbf16>,
    %c4_i32_19 = arith.constant 4 : i32
    %36 = arith.muli %arg0, %c4_i32_19 : i32
    %c3_i32 = arith.constant 3 : i32
    %37 = arith.addi %36, %c3_i32 : i32
    %38 = arith.index_cast %37 : i32 to index
    %39 = memref.load %arg2[%38] : memref<8xi32, #tpu.memory_space<smem>>
    %40 = tpu.assume_multiple %39, 8 : i32
    %c0_20 = arith.constant 0 : index
    %41 = arith.index_cast %40 : i32 to index
    %c0_21 = arith.constant 0 : index
    %42 = vector.load %arg4[%c0_20, %41, %c0_21] : memref<1x256x4xbf16, #tpu.memory_space<vmem>>, vector<1x128x4xbf16>
    %43 = vector.shape_cast %42 : vector<1x128x4xbf16> to vector<128x4xbf16>
    %c48 = arith.constant 48 : index
    %c0_22 = arith.constant 0 : index
    %44 = vector.load %arg3[%c48, %c0_22] : memref<64x128xbf16, #tpu.memory_space<vmem>>, vector<16x128xbf16>
    %cst_23 = arith.constant dense<0.000000e+00> : vector<16x4xf32>
    %45 = tpu.matmul %44, %43, %cst_23 {dimension_numbers = #tpu.dot_dimension_numbers<[1], [0], [0], [1], [0, 0, 1, 1], [], []>} : vector<16x128xbf16>, vector<128x4xbf16>, vector<16x4xf32> -> vector<16x4xf32>
    %46 = arith.truncf %45 : vector<16x4xf32> to vector<16x4xbf16>
    %c48_24 = arith.constant 48 : index
    %c0_25 = arith.constant 0 : index
    %47 = vector.load %arg5[%c48_24, %c0_25] : memref<64x4xbf16, #tpu.memory_space<vmem>>, vector<16x4xbf16>
    tpu.vector_store %arg5[%c48_24, %c0_25], %46 {strides = array<i32>} : memref<64x4xbf16, #tpu.memory_space<vmem>>, vector<16x4xbf16>,
    return
  }
  func.func @transform_0(%arg0: i32, %arg1: memref<2xi32, #tpu.memory_space<smem>>, %arg2: memref<8xi32, #tpu.memory_space<smem>>) -> (i32, i32) {
    %c0_i32 = arith.constant 0 : i32
    %c0_i32_0 = arith.constant 0 : i32
    return %arg0, %c0_i32 : i32, i32
  }
  func.func @transform_1(%arg0: i32, %arg1: memref<2xi32, #tpu.memory_space<smem>>, %arg2: memref<8xi32, #tpu.memory_space<smem>>) -> (i32, i32, i32) {
    %0 = arith.index_cast %arg0 : i32 to index
    %1 = memref.load %arg1[%0] : memref<2xi32, #tpu.memory_space<smem>>
    %c0_i32 = arith.constant 0 : i32
    %c0_i32_0 = arith.constant 0 : i32
    %c0_i32_1 = arith.constant 0 : i32
    return %1, %c0_i32, %c0_i32_0 : i32, i32, i32
  }
  func.func @transform_2(%arg0: i32, %arg1: memref<2xi32, #tpu.memory_space<smem>>, %arg2: memref<8xi32, #tpu.memory_space<smem>>) -> (i32, i32) {
    %c0_i32 = arith.constant 0 : i32
    %c0_i32_0 = arith.constant 0 : i32
    return %arg0, %c0_i32 : i32, i32
  }
}

module attributes {stable_mosaic.version = 11 : i64} {
  func.func @_mlp_head_kernel(%arg0: i32, %arg1: i32, %arg2: memref<16x64xbf16, #tpu.memory_space<vmem>>, %arg3: memref<64x32xbf16, #tpu.memory_space<vmem>>, %arg4: memref<1x32xf32, #tpu.memory_space<vmem>>, %arg5: memref<32x32xbf16, #tpu.memory_space<vmem>>, %arg6: memref<1x32xf32, #tpu.memory_space<vmem>>, %arg7: memref<32x128xbf16, #tpu.memory_space<vmem>>, %arg8: memref<1x128xf32, #tpu.memory_space<vmem>>, %arg9: memref<16x32xbf16, #tpu.memory_space<vmem>>, %arg10: memref<16x128xf32, #tpu.memory_space<vmem>>, %arg11: memref<16x32xf32, #tpu.memory_space<vmem>>) attributes {dimension_semantics = [#tpu.dimension_semantics<parallel>, #tpu.dimension_semantics<arbitrary>], iteration_bounds = array<i64: 1, 1>, scalar_prefetch = 0 : i64, scratch_operands = 1 : i64, tpu.core_type = #tpu.core_type<tc>, window_params = [{transform_indices = @transform_0, window_bounds = array<i64: 16, 64>}, {transform_indices = @transform_1, window_bounds = array<i64: 64, 32>}, {pipeline_mode = #tpu.pipeline_mode<synchronous>, transform_indices = @transform_2, window_bounds = array<i64: 1, 32>}, {pipeline_mode = #tpu.pipeline_mode<synchronous>, transform_indices = @transform_3, window_bounds = array<i64: 32, 32>}, {pipeline_mode = #tpu.pipeline_mode<synchronous>, transform_indices = @transform_4, window_bounds = array<i64: 1, 32>}, {pipeline_mode = #tpu.pipeline_mode<synchronous>, transform_indices = @transform_5, window_bounds = array<i64: 32, 128>}, {pipeline_mode = #tpu.pipeline_mode<synchronous>, transform_indices = @transform_6, window_bounds = array<i64: 1, 128>}, {transform_indices = @transform_7, window_bounds = array<i64: 16, 32>}, {transform_indices = @transform_8, window_bounds = array<i64: 16, 128>}]} {
    %c0_i32 = arith.constant 0 : i32
    %0 = arith.cmpi eq, %arg1, %c0_i32 : i32
    %1 = arith.extui %0 : i1 to i32
    %c0_i32_0 = arith.constant 0 : i32
    %2 = arith.cmpi ne, %1, %c0_i32_0 : i32
    scf.if %2 {
      %cst_10 = arith.constant 0.000000e+00 : f32
      %12 = vector.broadcast %cst_10 : f32 to vector<16x32xf32>
      %c0_11 = arith.constant 0 : index
      %c0_12 = arith.constant 0 : index
      %13 = vector.load %arg11[%c0_11, %c0_12] : memref<16x32xf32, #tpu.memory_space<vmem>>, vector<16x32xf32>
      tpu.vector_store %arg11[%c0_11, %c0_12], %12 {strides = array<i32>} : memref<16x32xf32, #tpu.memory_space<vmem>>, vector<16x32xf32>,
    } else {
    }
    %c0 = arith.constant 0 : index
    %c0_1 = arith.constant 0 : index
    %3 = vector.load %arg11[%c0, %c0_1] : memref<16x32xf32, #tpu.memory_space<vmem>>, vector<16x32xf32>
    %c0_2 = arith.constant 0 : index
    %c0_3 = arith.constant 0 : index
    %4 = vector.load %arg2[%c0_2, %c0_3] : memref<16x64xbf16, #tpu.memory_space<vmem>>, vector<16x64xbf16>
    %c0_4 = arith.constant 0 : index
    %c0_5 = arith.constant 0 : index
    %5 = vector.load %arg3[%c0_4, %c0_5] : memref<64x32xbf16, #tpu.memory_space<vmem>>, vector<64x32xbf16>
    %cst = arith.constant dense<0.000000e+00> : vector<16x32xf32>
    %6 = tpu.matmul %4, %5, %cst {dimension_numbers = #tpu.dot_dimension_numbers<[1], [0], [0], [1], [0, 0, 1, 1], [], []>} : vector<16x64xbf16>, vector<64x32xbf16>, vector<16x32xf32> -> vector<16x32xf32>
    %7 = arith.addf %3, %6 : vector<16x32xf32>
    %c0_6 = arith.constant 0 : index
    %c0_7 = arith.constant 0 : index
    %8 = vector.load %arg11[%c0_6, %c0_7] : memref<16x32xf32, #tpu.memory_space<vmem>>, vector<16x32xf32>
    tpu.vector_store %arg11[%c0_6, %c0_7], %7 {strides = array<i32>} : memref<16x32xf32, #tpu.memory_space<vmem>>, vector<16x32xf32>,
    %c0_i32_8 = arith.constant 0 : i32
    %9 = arith.cmpi eq, %arg1, %c0_i32_8 : i32
    %10 = arith.extui %9 : i1 to i32
    %c0_i32_9 = arith.constant 0 : i32
    %11 = arith.cmpi ne, %10, %c0_i32_9 : i32
    scf.if %11 {
      %c0_10 = arith.constant 0 : index
      %c0_11 = arith.constant 0 : index
      %12 = vector.load %arg11[%c0_10, %c0_11] : memref<16x32xf32, #tpu.memory_space<vmem>>, vector<16x32xf32>
      %c0_12 = arith.constant 0 : index
      %c0_13 = arith.constant 0 : index
      %13 = vector.load %arg4[%c0_12, %c0_13] : memref<1x32xf32, #tpu.memory_space<vmem>>, vector<1x32xf32>
      %14 = vector.broadcast %13 : vector<1x32xf32> to vector<16x32xf32>
      %15 = arith.addf %12, %14 : vector<16x32xf32>
      %cst_14 = arith.constant 0.000000e+00 : f32
      %16 = vector.broadcast %cst_14 : f32 to vector<16x32xf32>
      %17 = arith.maximumf %15, %16 : vector<16x32xf32>
      %18 = arith.truncf %17 : vector<16x32xf32> to vector<16x32xbf16>
      %c0_15 = arith.constant 0 : index
      %c0_16 = arith.constant 0 : index
      %19 = vector.load %arg5[%c0_15, %c0_16] : memref<32x32xbf16, #tpu.memory_space<vmem>>, vector<32x32xbf16>
      %cst_17 = arith.constant dense<0.000000e+00> : vector<16x32xf32>
      %20 = tpu.matmul %18, %19, %cst_17 {dimension_numbers = #tpu.dot_dimension_numbers<[1], [0], [0], [1], [0, 0, 1, 1], [], []>} : vector<16x32xbf16>, vector<32x32xbf16>, vector<16x32xf32> -> vector<16x32xf32>
      %c0_18 = arith.constant 0 : index
      %c0_19 = arith.constant 0 : index
      %21 = vector.load %arg6[%c0_18, %c0_19] : memref<1x32xf32, #tpu.memory_space<vmem>>, vector<1x32xf32>
      %22 = vector.broadcast %21 : vector<1x32xf32> to vector<16x32xf32>
      %23 = arith.addf %20, %22 : vector<16x32xf32>
      %cst_20 = arith.constant 0.000000e+00 : f32
      %24 = vector.broadcast %cst_20 : f32 to vector<16x32xf32>
      %25 = arith.maximumf %23, %24 : vector<16x32xf32>
      %26 = arith.truncf %25 : vector<16x32xf32> to vector<16x32xbf16>
      %c0_21 = arith.constant 0 : index
      %c0_22 = arith.constant 0 : index
      %27 = vector.load %arg9[%c0_21, %c0_22] : memref<16x32xbf16, #tpu.memory_space<vmem>>, vector<16x32xbf16>
      tpu.vector_store %arg9[%c0_21, %c0_22], %26 {strides = array<i32>} : memref<16x32xbf16, #tpu.memory_space<vmem>>, vector<16x32xbf16>,
      %28 = arith.truncf %25 : vector<16x32xf32> to vector<16x32xbf16>
      %c0_23 = arith.constant 0 : index
      %c0_24 = arith.constant 0 : index
      %29 = vector.load %arg7[%c0_23, %c0_24] : memref<32x128xbf16, #tpu.memory_space<vmem>>, vector<32x128xbf16>
      %cst_25 = arith.constant dense<0.000000e+00> : vector<16x128xf32>
      %30 = tpu.matmul %28, %29, %cst_25 {dimension_numbers = #tpu.dot_dimension_numbers<[1], [0], [0], [1], [0, 0, 1, 1], [], []>} : vector<16x32xbf16>, vector<32x128xbf16>, vector<16x128xf32> -> vector<16x128xf32>
      %c0_26 = arith.constant 0 : index
      %c0_27 = arith.constant 0 : index
      %31 = vector.load %arg8[%c0_26, %c0_27] : memref<1x128xf32, #tpu.memory_space<vmem>>, vector<1x128xf32>
      %32 = vector.broadcast %31 : vector<1x128xf32> to vector<16x128xf32>
      %33 = arith.addf %30, %32 : vector<16x128xf32>
      %c0_28 = arith.constant 0 : index
      %c0_29 = arith.constant 0 : index
      %34 = vector.load %arg10[%c0_28, %c0_29] : memref<16x128xf32, #tpu.memory_space<vmem>>, vector<16x128xf32>
      tpu.vector_store %arg10[%c0_28, %c0_29], %33 {strides = array<i32>} : memref<16x128xf32, #tpu.memory_space<vmem>>, vector<16x128xf32>,
    } else {
    }
    return
  }
  func.func @transform_0(%arg0: i32, %arg1: i32) -> (i32, i32) {
    %c0_i32 = arith.constant 0 : i32
    return %arg0, %arg1 : i32, i32
  }
  func.func @transform_1(%arg0: i32, %arg1: i32) -> (i32, i32) {
    %c0_i32 = arith.constant 0 : i32
    %c0_i32_0 = arith.constant 0 : i32
    return %arg1, %c0_i32 : i32, i32
  }
  func.func @transform_2(%arg0: i32, %arg1: i32) -> (i32, i32) {
    %c0_i32 = arith.constant 0 : i32
    %c0_i32_0 = arith.constant 0 : i32
    %c0_i32_1 = arith.constant 0 : i32
    return %c0_i32, %c0_i32_0 : i32, i32
  }
  func.func @transform_3(%arg0: i32, %arg1: i32) -> (i32, i32) {
    %c0_i32 = arith.constant 0 : i32
    %c0_i32_0 = arith.constant 0 : i32
    %c0_i32_1 = arith.constant 0 : i32
    return %c0_i32, %c0_i32_0 : i32, i32
  }
  func.func @transform_4(%arg0: i32, %arg1: i32) -> (i32, i32) {
    %c0_i32 = arith.constant 0 : i32
    %c0_i32_0 = arith.constant 0 : i32
    %c0_i32_1 = arith.constant 0 : i32
    return %c0_i32, %c0_i32_0 : i32, i32
  }
  func.func @transform_5(%arg0: i32, %arg1: i32) -> (i32, i32) {
    %c0_i32 = arith.constant 0 : i32
    %c0_i32_0 = arith.constant 0 : i32
    %c0_i32_1 = arith.constant 0 : i32
    return %c0_i32, %c0_i32_0 : i32, i32
  }
  func.func @transform_6(%arg0: i32, %arg1: i32) -> (i32, i32) {
    %c0_i32 = arith.constant 0 : i32
    %c0_i32_0 = arith.constant 0 : i32
    %c0_i32_1 = arith.constant 0 : i32
    return %c0_i32, %c0_i32_0 : i32, i32
  }
  func.func @transform_7(%arg0: i32, %arg1: i32) -> (i32, i32) {
    %c0_i32 = arith.constant 0 : i32
    %c0_i32_0 = arith.constant 0 : i32
    return %arg0, %c0_i32 : i32, i32
  }
  func.func @transform_8(%arg0: i32, %arg1: i32) -> (i32, i32) {
    %c0_i32 = arith.constant 0 : i32
    %c0_i32_0 = arith.constant 0 : i32
    return %arg0, %c0_i32 : i32, i32
  }
}

</mosaic_0001>

<bundles_post_ra>
// kernel: roi_box_head_forward.2
= control target key start
LH: loop header
LB: loop body
LE: loop exit
PB: predicated region body
PF: predicated region fallthrough
CT: control target
= control target key end

     0   :  { %s1227_s0 = inlined_call_operand.vmem [shape: s32[2], index: 0, kind: input, shape index: {}]   ;;  %s1228_s2 = inlined_call_operand.vmem [shape: bf16[128,128], index: 2, kind: input, shape index: {}]   ;;  %s1229_s3 = inlined_call_operand.vmem [shape: bf16[2,256,4], index: 3, kind: input, shape index: {}]   ;;  %s1230_s4 = inlined_call_operand.vmem [shape: bf16[128,4], index: 4, kind: output, shape index: {}]   ;;  %s1231_s1 = inlined_call_operand.vmem [shape: s32[8], index: 1, kind: input, shape index: {}]  }
   0x1   :  { %s9_s17 = sshll.u32 %s1227_s0, 4  ;;  %s13_s20 = sshll.u32 %s1231_s1, 4  ;;  %s10_s17 = int_to_ptr.vmem [resolvable:$true] %s9_s17  ;;  %s14_s20 = int_to_ptr.vmem [resolvable:$true] %s13_s20 }
   0x2   :  { %s1015_s21 = scalar_lea.vmem %s10_s17, 16  ;;  %p1020_p1 = scmp.lt.s32.totalorder %s10_s17, %s10_s17 }
   0x3   :  { %p1016_p0 = scmp.ne.s32.totalorder %s10_s17, %s1015_s21  ;;  %p1021_p2 = scmp.lt.s32.totalorder %s1015_s21, %s1015_s21 }
   0x5   :  { %p1022_p3 = por %p1021_p2, %p1020_p1 }
   0x7   :  { %p1023_p4 = pnand %p1022_p3, %p1016_p0 }
   0x9   :  { %1026 = shalt.err (!%p1023_p4)  }
   0xa   :  { %s1049_s22 = smov [#allocation3]   ;;  %s1027_s23 = scalar_lea.vmem %s14_s20, 16 }
   0xb   :  { %12 = dma.vmem_to_smem %s10_s17, 16, %s1049_s22, [#allocation2] }
   0xc   :  { %p1028_p5 = scmp.ne.s32.totalorder %s14_s20, %s1027_s23  ;;  %p1032_p6 = scmp.lt.s32.totalorder %s14_s20, %s14_s20 }
   0xd   :  { %p1033_p7 = scmp.lt.s32.totalorder %s1027_s23, %s1027_s23 }
   0xf   :  { %p1034_p8 = por %p1033_p7, %p1032_p6 }
  0x11   :  { %p1035_p9 = pnand %p1034_p8, %p1028_p5 }
  0x13   :  { %1038 = shalt.err (!%p1035_p9)  }
  0x14   :  { %s1050_s0 = smov [#allocation4]  }
  0x15   :  { %16 = dma.vmem_to_smem %s14_s20, 16, %s1050_s0, [#allocation2] }
  0x16   :  { %1043 = dma.done.wait [#allocation2], 32 }
  0x17   :  { %1044 = vsyncadd [#allocation2], 4294967264 }
  0x18   :  { %18 = sfence }
  0x19   :  { %s1084_s1 = smov 0  }
  0x1a LB: > { %s780_s24 = sadd.s32 4294967295, %s1047_s1   ;;  %p784_p10 = scmp.ge.s32.totalorder %s1047_s1, 1  ;;  %s1047_s1 = sphi %s1084_s1, %s24_s1  }
  0x1b   : > { %p139_p11 = scmp.lt.s32.totalorder %s1047_s1, 3 }
  0x1d   : > { %p140_p12 = pnand %p784_p10, %p139_p11 }
  0x1e   : > { %s173_s25 = sld [smem:[#allocation3 + %s780_s24]] (!%p140_p12)  ;;  %s1092_s26 = sshll.u32 (!%p140_p12), %s780_s24, 2  ;;  %v1051_v0 = vmov (!%p140_p12), 0.0   ;;  %vm1052_vm0 = vmmov (!%p140_p12), 0   ;;  %vm314_vm1 = vcmask (!%p140_p12), 27648  }
  0x1f   : > { %143 = sbr.rel (%p140_p12) target bundleno = 325 (0x145), region = 28  ;;  %887 = vmatprep.subr.bf16.mxu0 (!%p140_p12), %v1051_v0  ;;  %907 = vmatprep.subr.bf16.mxu1 (!%p140_p12), %v1051_v0  ;;  %s188_s27 = sld [smem:[#allocation4 + %s1092_s26]] (!%p140_p12) }
  0x20   : > { %s317_s28 = sadd.s32 (!%p140_p12), 1, %s1092_s26  ;;  %903 = vmatprep.mubr.msk.bf16.mxu0 (!%p140_p12), %vm1052_vm0, %v1051_v0  ;;  %923 = vmatprep.mubr.msk.bf16.mxu1 (!%p140_p12), %vm1052_vm0, %v1051_v0  ;;  %s785_s30 = sshll.u32 (!%p140_p12), %s780_s24, 3 }
  0x21   : > { %s318_s29 = sld [smem:[#allocation4 + %s317_s28]] (!%p140_p12)  ;;  %p168_p13 = scmp.lt.s32.totalorder (!%p140_p12), %s785_s30, 15 }
  0x22   : > { %s446_s5 = sadd.s32 (!%p140_p12), 2, %s1092_s26  ;;  %s575_s20 = sadd.s32 (!%p140_p12), 3, %s1092_s26 }
  0x23   : > { %s447_s21 = sld [smem:[#allocation4 + %s446_s5]] (!%p140_p12) }
  0x24   : > { %p174_p0 = scmp.lt.s32.totalorder (!%p140_p12), %s173_s25, 1  ;;  %s576_s22 = sld [smem:[#allocation4 + %s575_s20]] (!%p140_p12) }
  0x25   : > { %s189_s6 = sshra.s32 (!%p140_p12), %s188_s27, 3 }
  0x26   : > { %s1233_s30 = smov (!%p168_p13, %s785_s30), 15  ;;  %s1235_s25 = smov (!%p174_p0, %s173_s25), 1 }
  0x27   : > { %s786_s7 = sshll.u32 %s1233_s30, 2  ;;  %s792_s8 = sshll.u32 %s189_s6, 2 }
  0x28   : > { %s319_s9 = sshra.s32 %s318_s29, 3  ;;  %s842_s10 = sshll.u32 %s1235_s25, 7 }
  0x29   : > { %s804_s11 = sshll.u32 %s319_s9, 2  ;;  %s1109_s14 = scalar_lea.vmem %s1229_s3, %s842_s10 }
  0x2a   : > { %s1116_s17 = scalar_lea.vmem %s1228_s2, %s786_s7  ;;  %s1119_s18 = scalar_lea.vmem %s1109_s14, %s792_s8 }
  0x2b   : > { %s1122_s19 = scalar_lea.vmem %s1109_s14, %s804_s11  ;;  %v979_v1 = vld [vmem:[%s1119_s18] sm:$0xff]   ;;  %v981_v3 = vld [vmem:[%s1119_s18 + $0x8] sm:$0xff]   ;;  %v983_v5 = vld [vmem:[%s1119_s18 + $0x10] sm:$0xff]   ;;  %s448_s23 = sshra.s32 %s447_s21, 3 }
  0x2c   : > { %v980_v2 = vld [vmem:[%s1122_s19] sm:$0xff]   ;;  %888 = vmatpush3.bf16.msra.mxu0 %v979_v1  ;;  %v982_v4 = vld [vmem:[%s1122_s19 + $0x8] sm:$0xff]   ;;  %v984_v6 = vld [vmem:[%s1122_s19 + $0x10] sm:$0xff]   ;;  %s577_s0 = sshra.s32 %s576_s22, 3  ;;  %s816_s24 = sshll.u32 %s448_s23, 2 }
  0x2d   : > { %908 = vmatpush3.bf16.msra.mxu1 %v980_v2  ;;  %889 = vmatprep.subr.bf16.mxu0 %v1051_v0  ;;  %v985_v7 = vld [vmem:[%s1119_s18 + $0x18] sm:$0xff]   ;;  %v987_v9 = vld [vmem:[%s1119_s18 + $0x20] sm:$0xff]   ;;  %s828_s25 = sshll.u32 %s577_s0, 2  ;;  %s1144_s26 = scalar_lea.vmem %s1109_s14, %s816_s24  ;;  %v989_v11 = vld [vmem:[%s1119_s18 + $0x28] sm:$0xff]  }
  0x2e   : > { %909 = vmatprep.subr.bf16.mxu1 %v1051_v0  ;;  %v986_v8 = vld [vmem:[%s1122_s19 + $0x18] sm:$0xff]   ;;  %v988_v10 = vld [vmem:[%s1122_s19 + $0x20] sm:$0xff]   ;;  %s1147_s27 = scalar_lea.vmem %s1109_s14, %s828_s25  ;;  %v990_v12 = vld [vmem:[%s1122_s19 + $0x28] sm:$0xff]   ;;  %s1206_s5 = scalar_lea.vmem %s1230_s4, %s786_s7 }
  0x2f   : > { %v991_v13 = vld [vmem:[%s1119_s18 + $0x30] sm:$0xff]   ;;  %v993_v15 = vld [vmem:[%s1119_s18 + $0x38] sm:$0xff]   ;;  %v995_v17 = vld [vmem:[%s1116_s17] sm:$0xff]  }
  0x30   : > { %890 = vmatpush3.bf16.msra.mxu0 %v981_v3  ;;  %v992_v14 = vld [vmem:[%s1122_s19 + $0x30] sm:$0xff]   ;;  %v994_v16 = vld [vmem:[%s1122_s19 + $0x38] sm:$0xff]   ;;  %v996_v18 = vld [vmem:[%s1116_s17 + $0x8] sm:$0xff]  }
  0x31   : > { %910 = vmatpush3.bf16.msra.mxu1 %v982_v4  ;;  %891 = vmatprep.subr.bf16.mxu0 %v1051_v0  ;;  %v997_v19 = vld [vmem:[%s1144_s26] sm:$0xff]   ;;  %v999_v21 = vld [vmem:[%s1144_s26 + $0x8] sm:$0xff]   ;;  %v1001_v23 = vld [vmem:[%s1144_s26 + $0x10] sm:$0xff]  }
  0x32   : > { %911 = vmatprep.subr.bf16.mxu1 %v1051_v0  ;;  %v998_v20 = vld [vmem:[%s1147_s27] sm:$0xff]   ;;  %v1000_v22 = vld [vmem:[%s1147_s27 + $0x8] sm:$0xff]   ;;  %v1002_v24 = vld [vmem:[%s1147_s27 + $0x10] sm:$0xff]  }
  0x33   : > { %v1003_v25 = vld [vmem:[%s1144_s26 + $0x18] sm:$0xff]   ;;  %v1005_v27 = vld [vmem:[%s1144_s26 + $0x20] sm:$0xff]   ;;  %v1007_v29 = vld [vmem:[%s1144_s26 + $0x28] sm:$0xff]  }
  0x34   : > { %892 = vmatpush3.bf16.msra.mxu0 %v983_v5  ;;  %v1004_v26 = vld [vmem:[%s1147_s27 + $0x18] sm:$0xff]   ;;  %v1006_v28 = vld [vmem:[%s1147_s27 + $0x20] sm:$0xff]   ;;  %v1008_v30 = vld [vmem:[%s1147_s27 + $0x28] sm:$0xff]  }
  0x35   : > { %912 = vmatpush3.bf16.msra.mxu1 %v984_v6  ;;  %893 = vmatprep.subr.bf16.mxu0 %v1051_v0  ;;  %v1009_v31 = vld [vmem:[%s1144_s26 + $0x30] sm:$0xff]   ;;  %v1011_v33 = vld [vmem:[%s1144_s26 + $0x38] sm:$0xff]  }
  0x36   : > { %913 = vmatprep.subr.bf16.mxu1 %v1051_v0  ;;  %v1010_v32 = vld [vmem:[%s1147_s27 + $0x30] sm:$0xff]   ;;  %v1012_v34 = vld [vmem:[%s1147_s27 + $0x38] sm:$0xff]  }
  0x37   : > { %v1013_v35 = vld [vmem:[%s1116_s17 + $0x10] sm:$0xff]   ;;  %v1014_v36 = vld [vmem:[%s1116_s17 + $0x18] sm:$0xff]  }
  0x38   : > { %894 = vmatpush3.bf16.msra.mxu0 %v985_v7 }
  0x39   : > { %914 = vmatpush3.bf16.msra.mxu1 %v986_v8  ;;  %895 = vmatprep.subr.bf16.mxu0 %v1051_v0 }
  0x3a   : > { %915 = vmatprep.subr.bf16.mxu1 %v1051_v0 }
  0x3c   : > { %896 = vmatpush3.bf16.msra.mxu0 %v987_v9 }
  0x3d   : > { %916 = vmatpush3.bf16.msra.mxu1 %v988_v10  ;;  %897 = vmatprep.subr.bf16.mxu0 %v1051_v0 }
  0x3e   : > { %917 = vmatprep.subr.bf16.mxu1 %v1051_v0 }
  0x40   : > { %898 = vmatpush3.bf16.msra.mxu0 %v989_v11 }
  0x41   : > { %918 = vmatpush3.bf16.msra.mxu1 %v990_v12  ;;  %899 = vmatprep.subr.bf16.mxu0 %v1051_v0 }
  0x42   : > { %919 = vmatprep.subr.bf16.mxu1 %v1051_v0 }
  0x44   : > { %900 = vmatpush3.bf16.msra.mxu0 %v991_v13 }
  0x45   : > { %920 = vmatpush3.bf16.msra.mxu1 %v992_v14  ;;  %901 = vmatprep.subr.bf16.mxu0 %v1051_v0 }
  0x46   : > { %921 = vmatprep.subr.bf16.mxu1 %v1051_v0 }
  0x48   : > { %902 = vmatpush3.bf16.msra.mxu0 %v993_v15 }
  0x49   : > { %922 = vmatpush3.bf16.msra.mxu1 %v994_v16  ;;  %927 = vmatprep.subr.bf16.mxu0 %v1051_v0 }
  0x4a   : > { %947 = vmatprep.subr.bf16.mxu1 %v1051_v0 }
  0x4b   : > { %904 = vmatmul.mubr.bf16.vlgmr.msra.gmra.mrb[0].mxu0 %v995_v17 }
  0x4c   : > { %924 = vmatmul.mubr.bf16.vlgmr.msra.gmra.mrb[0].mxu1 %v996_v18  ;;  %928 = vmatpush3.bf16.msra.mxu0 %v997_v19 }
  0x4d   : > { %948 = vmatpush3.bf16.msra.mxu1 %v998_v20  ;;  %929 = vmatprep.subr.bf16.mxu0 %v1051_v0 }
  0x4e   : > { %949 = vmatprep.subr.bf16.mxu1 %v1051_v0  ;;  %943 = vmatprep.mubr.msk.bf16.mxu0 %vm1052_vm0, %v1051_v0 }
  0x4f   : > { %963 = vmatprep.mubr.msk.bf16.mxu1 %vm1052_vm0, %v1051_v0 }
  0x50   : > { %930 = vmatpush3.bf16.msra.mxu0 %v999_v21 }
  0x51   : > { %950 = vmatpush3.bf16.msra.mxu1 %v1000_v22  ;;  %931 = vmatprep.subr.bf16.mxu0 %v1051_v0 }
  0x52   : > { %951 = vmatprep.subr.bf16.mxu1 %v1051_v0 }
  0x54   : > { %932 = vmatpush3.bf16.msra.mxu0 %v1001_v23 }
  0x55   : > { %952 = vmatpush3.bf16.msra.mxu1 %v1002_v24  ;;  %933 = vmatprep.subr.bf16.mxu0 %v1051_v0 }
  0x56   : > { %953 = vmatprep.subr.bf16.mxu1 %v1051_v0 }
  0x58   : > { %934 = vmatpush3.bf16.msra.mxu0 %v1003_v25 }
  0x59   : > { %954 = vmatpush3.bf16.msra.mxu1 %v1004_v26  ;;  %935 = vmatprep.subr.bf16.mxu0 %v1051_v0 }
  0x5a   : > { %955 = vmatprep.subr.bf16.mxu1 %v1051_v0 }
  0x5c   : > { %936 = vmatpush3.bf16.msra.mxu0 %v1005_v27 }
  0x5d   : > { %956 = vmatpush3.bf16.msra.mxu1 %v1006_v28  ;;  %937 = vmatprep.subr.bf16.mxu0 %v1051_v0 }
  0x5e   : > { %957 = vmatprep.subr.bf16.mxu1 %v1051_v0 }
  0x60   : > { %938 = vmatpush3.bf16.msra.mxu0 %v1007_v29 }
  0x61   : > { %958 = vmatpush3.bf16.msra.mxu1 %v1008_v30  ;;  %939 = vmatprep.subr.bf16.mxu0 %v1051_v0 }
  0x62   : > { %959 = vmatprep.subr.bf16.mxu1 %v1051_v0 }
  0x64   : > { %940 = vmatpush3.bf16.msra.mxu0 %v1009_v31 }
  0x65   : > { %960 = vmatpush3.bf16.msra.mxu1 %v1010_v32  ;;  %941 = vmatprep.subr.bf16.mxu0 %v1051_v0 }
  0x66   : > { %961 = vmatprep.subr.bf16.mxu1 %v1051_v0 }
  0x68   : > { %942 = vmatpush3.bf16.msra.mxu0 %v1011_v33 }
  0x69   : > { %962 = vmatpush3.bf16.msra.mxu1 %v1012_v34 }
  0x6b   : > { %944 = vmatmul.mubr.bf16.vlgmr.msra.gmra.mrb[4].mxu0 %v1013_v35 }
  0x6c   : > { %964 = vmatmul.mubr.bf16.vlgmr.msra.gmra.mrb[4].mxu1 %v1014_v36 }
 0x11e   : > { %v299_v37 = vpop.f32.mrb[0].mxu0 }
 0x11f   : > { %v843_v38 = vpack.c.bf16 %v299_v37, %v299_v37  ;;  %v429_v39 = vpop.f32.mrb[0].mxu1  ;;  %v905_v40 = vpop.f32.mrb[1].mxu0 }
 0x120   : > { %v845_v41 = vpack.c.bf16 %v429_v39, %v429_v39  ;;  %v925_v42 = vpop.f32.mrb[1].mxu1  ;;  %v302_v43 = vpop.f32.mrb[2].mxu0 }
 0x121   : > { %315 = vst.msk [vmem:[%s1206_s5] sm:$0xf] %vm314_vm1, %v843_v38  ;;  %v844_v44 = vpack.c.bf16 %v302_v43, %v302_v43  ;;  %v432_v45 = vpop.f32.mrb[2].mxu1  ;;  %v906_v46 = vpop.f32.mrb[3].mxu0 }
 0x122   : > { %444 = vst.msk [vmem:[%s1206_s5 + $0x8] sm:$0xf] %vm314_vm1, %v845_v41  ;;  %v846_v47 = vpack.c.bf16 %v432_v45, %v432_v45  ;;  %v926_v48 = vpop.f32.mrb[3].mxu1 }
 0x123   : > { %316 = vst.msk [vmem:[%s1206_s5 + $0x4] sm:$0xf] %vm314_vm1, %v844_v44 }
 0x124   : > { %445 = vst.msk [vmem:[%s1206_s5 + $0xc] sm:$0xf] %vm314_vm1, %v846_v47 }
 0x13e   : > { %v558_v49 = vpop.f32.mrb[4].mxu0 }
 0x13f   : > { %v847_v50 = vpack.c.bf16 %v558_v49, %v558_v49  ;;  %v687_v51 = vpop.f32.mrb[4].mxu1  ;;  %v945_v52 = vpop.f32.mrb[5].mxu0 }
 0x140   : > { %v849_v53 = vpack.c.bf16 %v687_v51, %v687_v51  ;;  %v965_v54 = vpop.f32.mrb[5].mxu1  ;;  %v561_v55 = vpop.f32.mrb[6].mxu0 }
 0x141   : > { %573 = vst.msk [vmem:[%s1206_s5 + $0x10] sm:$0xf] %vm314_vm1, %v847_v50  ;;  %v848_v56 = vpack.c.bf16 %v561_v55, %v561_v55  ;;  %v690_v57 = vpop.f32.mrb[6].mxu1  ;;  %v946_v58 = vpop.f32.mrb[7].mxu0 }
 0x142   : > { %702 = vst.msk [vmem:[%s1206_s5 + $0x18] sm:$0xf] %vm314_vm1, %v849_v53  ;;  %v850_v59 = vpack.c.bf16 %v690_v57, %v690_v57  ;;  %v966_v60 = vpop.f32.mrb[7].mxu1 }
 0x143   : > { %574 = vst.msk [vmem:[%s1206_s5 + $0x14] sm:$0xf] %vm314_vm1, %v848_v56 }
 0x144   : > { %703 = vst.msk [vmem:[%s1206_s5 + $0x1c] sm:$0xf] %vm314_vm1, %v850_v59 }
 0x145 PF: > { %s24_s1 = sadd.s32 1, %s1047_s1  }
 0x146   : > { %p21_p1 = scmp.ge.s32.totalorder %s24_s1, 4  }
 0x148   :  { %23 = sbr.rel (!%p21_p1) target bundleno = 26 (0x1a), region = 65 }

// kernel: roi_box_head_forward.3
= control target key start
LH: loop header
LB: loop body
LE: loop exit
PB: predicated region body
PF: predicated region fallthrough
CT: control target
= control target key end

     0   :  { %vm33_vm0 = vcmask 261120   ;;  %v370_v0 = vmov 0.0   ;;  %vm371_vm1 = vmmov 0   ;;  %vm77_vm2 = vcmask 523264   ;;  %s474_s1 = inlined_call_operand.vmem [shape: bf16[64,32], index: 1, kind: input, shape index: {}]   ;;  %s475_s0 = inlined_call_operand.vmem [shape: bf16[16,64], index: 0, kind: input, shape index: {}]   ;;  %s476_s3 = inlined_call_operand.vmem [shape: bf16[32,32], index: 3, kind: input, shape index: {}]   ;;  %s477_s2 = inlined_call_operand.vmem [shape: f32[1,32], index: 2, kind: input, shape index: {}]   ;;  %s478_s5 = inlined_call_operand.vmem [shape: bf16[32,128], index: 5, kind: input, shape index: {}]   ;;  %s479_s4 = inlined_call_operand.vmem [shape: f32[1,32], index: 4, kind: input, shape index: {}]   ;;  %s480_s7 = inlined_call_operand.vmem [shape: bf16[16,32], index: 7, kind: output, shape index: {0}]   ;;  %s481_s6 = inlined_call_operand.vmem [shape: f32[1,128], index: 6, kind: input, shape index: {}]   ;;  %s482_s8 = inlined_call_operand.vmem [shape: f32[16,128], index: 8, kind: output, shape index: {1}]  }
   0x1   :  { %331 = vmatprep.subr.bf16.mxu0 %v370_v0  ;;  %v361_v1 = vld [vmem:[%s474_s1] sm:$0xff]   ;;  %339 = vmatprep.mubr.msk.bf16.mxu0 %vm371_vm1, %v370_v0  ;;  %34 = vst.msk [vmem:[#allocation2] sm:$0xff] %vm33_vm0, %v370_v0  ;;  %35 = vst.msk [vmem:[#allocation2 + $0x8] sm:$0xff] %vm33_vm0, %v370_v0  ;;  %v362_v2 = vld [vmem:[%s474_s1 + $0x8] sm:$0xff]   ;;  %vm221_vm3 = vcmask 257024  }
   0x2   :  { %343 = vmatprep.subr.bf16.mxu1 %v370_v0  ;;  %347 = vmatprep.mubr.msk.bf16.mxu1 %vm371_vm1, %v370_v0  ;;  %v363_v3 = vld [vmem:[%s474_s1 + $0x10] sm:$0xff]   ;;  %v364_v4 = vld [vmem:[%s474_s1 + $0x18] sm:$0xff]   ;;  %v365_v5 = vld [vmem:[%s475_s0] sm:$0xff]  }
   0x3   :  { %332 = vmatpush3.bf16.msra.mxu0 %v361_v1  ;;  %v366_v6 = vld [vmem:[%s476_s3] sm:$0xff]   ;;  %v367_v7 = vld [vmem:[%s476_s3 + $0x8] sm:$0xff]  }
   0x4   :  { %333 = vmatprep.subr.bf16.mxu0 %v370_v0  ;;  %344 = vmatpush3.bf16.msra.mxu1 %v366_v6  ;;  %v307_v16 = vld [vmem:[%s477_s2] ss:$0 sm:$0xff]  ;;  %v369_v25 = vld [vmem:[%s478_s5 + $0x8] sm:$0xff]  }
   0x5   :  { %345 = vmatprep.subr.bf16.mxu1 %v370_v0  ;;  %v368_v24 = vld [vmem:[%s478_s5] sm:$0xff]  }
   0x6   :  { %v308_v26 = vld [vmem:[%s479_s4] ss:$0 sm:$0xff] }
   0x7   :  { %334 = vmatpush3.bf16.msra.mxu0 %v362_v2  ;;  %v314_v38 = vld [vmem:[%s481_s6] ss:$0 sm:$0xff] }
   0x8   :  { %335 = vmatprep.subr.bf16.mxu0 %v370_v0  ;;  %346 = vmatpush3.bf16.msra.mxu1 %v367_v7  ;;  %v36_v8 = vld [vmem:[#allocation2] sm:$0xff]  ;;  %v37_v10 = vld [vmem:[#allocation2 + $0x8] sm:$0xff] }
   0x9   :  { %351 = vmatprep.subr.bf16.mxu1 %v370_v0 }
   0xb   :  { %336 = vmatpush3.bf16.msra.mxu0 %v363_v3 }
   0xc   :  { %337 = vmatprep.subr.bf16.mxu0 %v370_v0 }
   0xf   :  { %338 = vmatpush3.bf16.msra.mxu0 %v364_v4 }
  0x12   :  { %340 = vmatmul.mubr.msk.bf16.vlgmr.msra.gmra.mrb[0].mxu0 %vm77_vm2, %v365_v5 }
  0xe5   :  { %v115_v9 = vpop.f32.mrb[0].mxu0 }
  0xe6   :  { %v122_v11 = vadd.f32 %v115_v9, %v36_v8  ;;  %v341_v12 = vpop.f32.mrb[1].mxu0 }
  0xe7   :  { %v118_v13 = vpop.f32.mrb[2].mxu0 }
  0xe8   :  { %125 = vst.msk [vmem:[#allocation2] sm:$0xff] %vm33_vm0, %v122_v11  ;;  %v123_v14 = vadd.f32 %v118_v13, %v37_v10  ;;  %v342_v15 = vpop.f32.mrb[3].mxu0 }
  0xea   :  { %126 = vst.msk [vmem:[#allocation2 + $0x8] sm:$0xff] %vm33_vm0, %v123_v14 }
  0xef   :  { %v130_v17 = vld [vmem:[#allocation2] sm:$0xff] }
  0xf0   :  { %v139_v18 = vadd.f32 %v307_v16, %v130_v17 }
  0xf1   :  { %v131_v19 = vld [vmem:[#allocation2 + $0x8] sm:$0xff] }
  0xf2   :  { %v140_v20 = vadd.f32 %v307_v16, %v131_v19  ;;  %v141_v21 = vmax.f32 %v139_v18, 0.0 }
  0xf4   :  { %v142_v22 = vmax.f32 %v140_v20, 0.0 }
  0xf6   :  { %v143_v23 = vpack.c.bf16 %v142_v22, %v141_v21 }
  0xf8   :  { %348 = vmatmul.mubr.msk.bf16.vlgmr.msra.gmra.mrb[0].mxu1 %vm33_vm0, %v143_v23 }
  0xf9   :  { %355 = vmatprep.mubr.msk.bf16.mxu1 %vm371_vm1, %v370_v0  ;;  %352 = vmatpush3.bf16.msra.mxu1 %v368_v24 }
  0xfa   :  { %353 = vmatprep.subr.bf16.mxu1 %v370_v0 }
  0xfd   :  { %354 = vmatpush3.bf16.msra.mxu1 %v369_v25 }
 0x1cb   :  { %v204_v27 = vpop.f32.mrb[0].mxu1 }
 0x1cc   :  { %v205_v28 = vadd.f32 %v308_v26, %v204_v27  ;;  %v349_v29 = vpop.f32.mrb[1].mxu1 }
 0x1cd   :  { %v207_v30 = vpop.f32.mrb[2].mxu1 }
 0x1ce   :  { %v211_v31 = vmax.f32 %v205_v28, 0.0  ;;  %v208_v32 = vadd.f32 %v308_v26, %v207_v30  ;;  %v350_v33 = vpop.f32.mrb[3].mxu1 }
 0x1d0   :  { %v318_v34 = vpack.c.bf16 %v211_v31, %v211_v31  ;;  %v212_v35 = vmax.f32 %v208_v32, 0.0 }
 0x1d2   :  { %222 = vst.msk [vmem:[%s480_s7] sm:$0xf] %vm221_vm3, %v318_v34  ;;  %v213_v36 = vpack.c.bf16 %v212_v35, %v211_v31  ;;  %v319_v37 = vpack.c.bf16 %v212_v35, %v212_v35 }
 0x1d4   :  { %223 = vst.msk [vmem:[%s480_s7 + $0x4] sm:$0xf] %vm221_vm3, %v319_v37  ;;  %356 = vmatmul.mubr.msk.bf16.vlgmr.msra.gmra.mrb[4].mxu1 %vm33_vm0, %v213_v36 }
 0x2a7   :  { %v284_v39 = vpop.f32.mrb[4].mxu1 }
 0x2a8   :  { %v285_v40 = vadd.f32 %v314_v38, %v284_v39  ;;  %v357_v41 = vpop.f32.mrb[5].mxu1 }
 0x2a9   :  { %v287_v42 = vpop.f32.mrb[6].mxu1 }
 0x2aa   :  { %291 = vst [vmem:[%s482_s8] sm:$0xff] %v285_v40  ;;  %v288_v43 = vadd.f32 %v314_v38, %v287_v42  ;;  %v358_v44 = vpop.f32.mrb[7].mxu1 }
 0x2ac   :  { %292 = vst [vmem:[%s482_s8 + $0x8] sm:$0xff] %v288_v43 }

</bundles_post_ra>
